<compile_context>
chip_gen: v5e
topology: v5e:2x2
jax: 0.10.0
libtpu: 0.0.40
codegen_flags: <defaults>
</compile_context>

<pallas_src>
import functools

import jax
import jax.numpy as jnp
from jax.experimental import pallas as pl
from jax.experimental.pallas import tpu as pltpu

DISABLE_CHECKS = False


# ----------------------------- Pallas kernel --------------------------------

def _linear_kernel(x_ref, w_ref, b_ref, o_ref, acc_ref):
    # x_ref: [tm, tk], w_ref: [tk, tn], b_ref: [1, tn], o_ref: [tm, tn]
    # acc_ref: [tm, tn] float32 scratch, resident across the K sweep.
    k = pl.program_id(2)

    @pl.when(k == 0)
    def _():
        acc_ref[...] = jnp.zeros_like(acc_ref)

    acc_ref[...] += jnp.dot(
        x_ref[...], w_ref[...], preferred_element_type=jnp.float32
    )

    # Bias is added exactly once, in the epilogue (not per reduction step).
    @pl.when(k == pl.num_programs(2) - 1)
    def _():
        o_ref[...] = (acc_ref[...] + b_ref[...].astype(jnp.float32)).astype(
            o_ref.dtype
        )


def _round_up(x, m):
    return (x + m - 1) // m * m


@functools.partial(jax.jit, static_argnames=("tm", "tn", "tk"))
def linear_pallas(x2d, w, b2d, *, tm=256, tn=256, tk=512):
    """y = x2d @ w + b2d via a tiled Pallas matmul.

    x2d: [M, K], w: [K, N], b2d: [1, N] -> [M, N]
    Tiles are clamped to the (padded) problem size so tiny demo shapes still
    lower to a single lane-dense block; realistic shapes get a real 3D grid.
    """
    M, K = x2d.shape
    K2, N = w.shape
    assert K == K2 and b2d.shape == (1, N)

    # Tile sizes: tm multiple of 8, tn/tk multiples of 128 (MXU/lane aligned),
    # clamped so small problems do not over-pad.
    tm = min(tm, _round_up(M, 8))
    tn = min(tn, _round_up(N, 128))
    tk = min(tk, _round_up(K, 128))

    Mp, Kp, Np = _round_up(M, tm), _round_up(K, tk), _round_up(N, tn)

    xp = x2d if (Mp == M and Kp == K) else jnp.pad(x2d, ((0, Mp - M), (0, Kp - K)))
    wp = w if (Kp == K and Np == N) else jnp.pad(w, ((0, Kp - K), (0, Np - N)))
    bp = b2d if Np == N else jnp.pad(b2d, ((0, 0), (0, Np - N)))

    itemsize = x2d.dtype.itemsize
    cost = pl.CostEstimate(
        flops=2 * Mp * Kp * Np,
        transcendentals=0,
        bytes_accessed=itemsize * (Mp * Kp + Kp * Np + Mp * Np + Np),
    )

    out = pl.pallas_call(
        _linear_kernel,
        out_shape=jax.ShapeDtypeStruct((Mp, Np), x2d.dtype),
        grid_spec=pltpu.PrefetchScalarGridSpec(
            num_scalar_prefetch=0,
            grid=(Mp // tm, Np // tn, Kp // tk),
            in_specs=[
                pl.BlockSpec((tm, tk), lambda i, j, k: (i, k)),
                pl.BlockSpec((tk, tn), lambda i, j, k: (k, j)),
                pl.BlockSpec((1, tn), lambda i, j, k: (0, j)),
            ],
            out_specs=pl.BlockSpec((tm, tn), lambda i, j, k: (i, j)),
            scratch_shapes=[pltpu.VMEM((tm, tn), jnp.float32)],
        ),
        compiler_params=pltpu.CompilerParams(
            dimension_semantics=("parallel", "parallel", "arbitrary"),
            vmem_limit_bytes=32 * 1024 * 1024,
        ),
        cost_estimate=cost,
    )(xp, wp, bp)

    if Mp != M or Np != N:
        out = out[:M, :N]
    return out


# ------------------------- Check module (JAX port) ---------------------------

class LinearLayer:
    """The wrapped layer: y = x @ W + b, with the matmul done in Pallas."""

    def __init__(self, dinp, dout, key):
        k1, k2 = jax.random.split(key)
        bound = 1.0 / (dinp ** 0.5)
        self.w = jax.random.uniform(k1, (dinp, dout), jnp.float32, -bound, bound)
        self.b = jax.random.uniform(k2, (1, dout), jnp.float32, -bound, bound)
        self.dinp = dinp
        self.dout = dout

    def __call__(self, x):
        lead = x.shape[:-1]
        x2d = x.reshape((-1, self.dinp))
        y2d = linear_pallas(x2d, self.w, self.b)
        return y2d.reshape(lead + (self.dout,))


class Check:
    """Faithful port of lizrd.support.ash.Check forward semantics."""

    def __init__(self, signature, layer, **kwargs):
        self.inp_sig, self.out_sig = signature.split('->')
        self.inp_sig = self.inp_sig.split()
        self.out_sig = self.out_sig.split()
        self.constants = kwargs
        self.layer = layer

    def _check_and_add(self, shape, current, past, index):
        if current.isnumeric():
            assert shape[index] == int(current)
        elif current.isalpha():
            if current in past:
                assert shape[index] == past[current]
            else:
                past[current] = shape[index]
        elif current == '...':
            if '...' in past:
                assert tuple(shape[:index + 1]) == tuple(past['...'])
            else:
                past['...'] = tuple(shape[:index + 1])

    def _check_and_add_all(self, shape, signature, past):
        for index, current in enumerate(signature,
                                        start=len(signature) - len(shape)):
            self._check_and_add(shape, current, past, index)

    def get_past(self):
        if DISABLE_CHECKS:
            return None
        past = {k: v for k, v in self.constants.items()}
        return past

    def before_layer(self, x, past):
        if DISABLE_CHECKS:
            return None
        self._check_and_add_all(x.shape, self.inp_sig, past)
        return past

    def after_layer(self, y, past):
        if DISABLE_CHECKS:
            return None
        self._check_and_add_all(y.shape, self.out_sig, past)

    def forward(self, x):
        past = self.get_past()
        self.before_layer(x, past)
        y = self.layer(x)
        self.after_layer(y, past)
        return y

    __call__ = forward


# --------------------------------- main --------------------------------------

if __name__ == "__main__":
    key = jax.random.PRNGKey(0)
    kx, kw = jax.random.split(key)

    batch, seq, dinp, dout = 2, 8, 32, 64
    x = jax.random.normal(kx, (batch, seq, dinp), jnp.float32)

    layer = LinearLayer(dinp, dout, kw)
    # Fully-named signature: with 3 tokens per side the Check index arithmetic
    # aligns each token with its dimension, so the dinp/dout constant checks
    # validate the feature dims (the '...' form mis-aligned them for this rank).
    checked = Check("batch seqlen dinp -> batch seqlen dout", layer,
                    dinp=dinp, dout=dout)

    y = checked(x)
    y = jax.block_until_ready(y)

    # Sanity check against plain-JAX reference.
    y_ref = x.reshape(-1, dinp) @ layer.w + layer.b
    y_ref = y_ref.reshape(batch, seq, dout)
    assert y.shape == (batch, seq, dout)
    assert jnp.allclose(y, y_ref, atol=1e-4, rtol=1e-4)

    print("KERNEL_OK")
</pallas_src>

<mosaic_0001>
module attributes {stable_mosaic.version = 11 : i64} {
  func.func @_linear_kernel(%arg0: i32, %arg1: i32, %arg2: i32, %arg3: memref<16x128xf32, #tpu.memory_space<vmem>>, %arg4: memref<128x128xf32, #tpu.memory_space<vmem>>, %arg5: memref<1x128xf32, #tpu.memory_space<vmem>>, %arg6: memref<16x128xf32, #tpu.memory_space<vmem>>, %arg7: memref<16x128xf32, #tpu.memory_space<vmem>>) attributes {dimension_semantics = [#tpu.dimension_semantics<parallel>, #tpu.dimension_semantics<parallel>, #tpu.dimension_semantics<arbitrary>], iteration_bounds = array<i64: 1, 1, 1>, scalar_prefetch = 0 : i64, scratch_operands = 1 : i64, tpu.core_type = #tpu.core_type<tc>, window_params = [{transform_indices = @transform_0, window_bounds = array<i64: 16, 128>}, {transform_indices = @transform_1, window_bounds = array<i64: 128, 128>}, {transform_indices = @transform_2, window_bounds = array<i64: 1, 128>}, {transform_indices = @transform_3, window_bounds = array<i64: 16, 128>}]} {
    %c0_i32 = arith.constant 0 : i32
    %0 = arith.cmpi eq, %arg2, %c0_i32 : i32
    %1 = arith.extui %0 : i1 to i32
    %c0_i32_0 = arith.constant 0 : i32
    %2 = arith.cmpi ne, %1, %c0_i32_0 : i32
    scf.if %2 {
      %cst_10 = arith.constant 0.000000e+00 : f32
      %12 = vector.broadcast %cst_10 : f32 to vector<16x128xf32>
      %c0_11 = arith.constant 0 : index
      %c0_12 = arith.constant 0 : index
      %13 = vector.load %arg7[%c0_11, %c0_12] : memref<16x128xf32, #tpu.memory_space<vmem>>, vector<16x128xf32>
      tpu.vector_store %arg7[%c0_11, %c0_12], %12 {strides = array<i32>} : memref<16x128xf32, #tpu.memory_space<vmem>>, vector<16x128xf32>,
    } else {
    }
    %c0 = arith.constant 0 : index
    %c0_1 = arith.constant 0 : index
    %3 = vector.load %arg7[%c0, %c0_1] : memref<16x128xf32, #tpu.memory_space<vmem>>, vector<16x128xf32>
    %c0_2 = arith.constant 0 : index
    %c0_3 = arith.constant 0 : index
    %4 = vector.load %arg3[%c0_2, %c0_3] : memref<16x128xf32, #tpu.memory_space<vmem>>, vector<16x128xf32>
    %c0_4 = arith.constant 0 : index
    %c0_5 = arith.constant 0 : index
    %5 = vector.load %arg4[%c0_4, %c0_5] : memref<128x128xf32, #tpu.memory_space<vmem>>, vector<128x128xf32>
    %cst = arith.constant dense<0.000000e+00> : vector<16x128xf32>
    %6 = tpu.matmul %4, %5, %cst {dimension_numbers = #tpu.dot_dimension_numbers<[1], [0], [0], [1], [0, 0, 1, 1], [], []>} : vector<16x128xf32>, vector<128x128xf32>, vector<16x128xf32> -> vector<16x128xf32>
    %7 = arith.addf %3, %6 : vector<16x128xf32>
    %c0_6 = arith.constant 0 : index
    %c0_7 = arith.constant 0 : index
    %8 = vector.load %arg7[%c0_6, %c0_7] : memref<16x128xf32, #tpu.memory_space<vmem>>, vector<16x128xf32>
    tpu.vector_store %arg7[%c0_6, %c0_7], %7 {strides = array<i32>} : memref<16x128xf32, #tpu.memory_space<vmem>>, vector<16x128xf32>,
    %c0_i32_8 = arith.constant 0 : i32
    %9 = arith.cmpi eq, %arg2, %c0_i32_8 : i32
    %10 = arith.extui %9 : i1 to i32
    %c0_i32_9 = arith.constant 0 : i32
    %11 = arith.cmpi ne, %10, %c0_i32_9 : i32
    scf.if %11 {
      %c0_10 = arith.constant 0 : index
      %c0_11 = arith.constant 0 : index
      %12 = vector.load %arg7[%c0_10, %c0_11] : memref<16x128xf32, #tpu.memory_space<vmem>>, vector<16x128xf32>
      %c0_12 = arith.constant 0 : index
      %c0_13 = arith.constant 0 : index
      %13 = vector.load %arg5[%c0_12, %c0_13] : memref<1x128xf32, #tpu.memory_space<vmem>>, vector<1x128xf32>
      %14 = vector.broadcast %13 : vector<1x128xf32> to vector<16x128xf32>
      %15 = arith.addf %12, %14 : vector<16x128xf32>
      %c0_14 = arith.constant 0 : index
      %c0_15 = arith.constant 0 : index
      %16 = vector.load %arg6[%c0_14, %c0_15] : memref<16x128xf32, #tpu.memory_space<vmem>>, vector<16x128xf32>
      tpu.vector_store %arg6[%c0_14, %c0_15], %15 {strides = array<i32>} : memref<16x128xf32, #tpu.memory_space<vmem>>, vector<16x128xf32>,
    } else {
    }
    return
  }
  func.func @transform_0(%arg0: i32, %arg1: i32, %arg2: i32) -> (i32, i32) {
    %c0_i32 = arith.constant 0 : i32
    return %arg0, %arg2 : i32, i32
  }
  func.func @transform_1(%arg0: i32, %arg1: i32, %arg2: i32) -> (i32, i32) {
    %c0_i32 = arith.constant 0 : i32
    return %arg2, %arg1 : i32, i32
  }
  func.func @transform_2(%arg0: i32, %arg1: i32, %arg2: i32) -> (i32, i32) {
    %c0_i32 = arith.constant 0 : i32
    %c0_i32_0 = arith.constant 0 : i32
    return %c0_i32, %arg1 : i32, i32
  }
  func.func @transform_3(%arg0: i32, %arg1: i32, %arg2: i32) -> (i32, i32) {
    %c0_i32 = arith.constant 0 : i32
    return %arg0, %arg1 : i32, i32
  }
}

</mosaic_0001>

<bundles_post_ra>
// kernel: linear_pallas.1
= control target key start
LH: loop header
LB: loop body
LE: loop exit
PB: predicated region body
PF: predicated region fallthrough
CT: control target
= control target key end

     0   :  { %s228_s0 = inlined_call_operand.vmem [shape: f32[16,128], index: 0, kind: input, shape index: {}]   ;;  %s229_s1 = inlined_call_operand.vmem [shape: f32[128,128], index: 1, kind: input, shape index: {}]   ;;  %s230_s2 = inlined_call_operand.vmem [shape: f32[1,128], index: 2, kind: input, shape index: {}]   ;;  %s231_s3 = inlined_call_operand.hbm [shape: f32[16,128], index: 3, kind: output, shape index: {}]  }
   0x1   :  { %v40_v0 = vld [vmem:[%s229_s1 + $0x78] sm:$0xff]  ;;  %v39_v1 = vld [vmem:[%s229_s1 + $0x70] sm:$0xff]  ;;  %v38_v2 = vld [vmem:[%s229_s1 + $0x68] sm:$0xff] }
   0x2   :  { %41 = vmatpush.msra.mxu0 %v40_v0  ;;  %99 = vmatpush.msra.mxu1 %v40_v0  ;;  %v37_v3 = vld [vmem:[%s229_s1 + $0x60] sm:$0xff]  ;;  %v36_v4 = vld [vmem:[%s229_s1 + $0x58] sm:$0xff] }
   0x4   :  { %42 = vmatpush.msra.mxu0 %v39_v1  ;;  %100 = vmatpush.msra.mxu1 %v39_v1 }
   0x6   :  { %43 = vmatpush.msra.mxu0 %v38_v2  ;;  %101 = vmatpush.msra.mxu1 %v38_v2 }
   0x7   :  { %8 = vsyncpa [#allocation4], 0  ;;  %v35_v5 = vld [vmem:[%s229_s1 + $0x50] sm:$0xff]  ;;  %v34_v6 = vld [vmem:[%s229_s1 + $0x48] sm:$0xff]  ;;  %s145_s23 = smov [#allocation3]   ;;  %s87_s26 = sshll.u32 %s231_s3, 4  ;;  %s88_s26 = int_to_ptr.hbm [resolvable:$true] %s87_s26 }
   0x8   :  { %44 = vmatpush.msra.mxu0 %v37_v3  ;;  %102 = vmatpush.msra.mxu1 %v37_v3  ;;  %v33_v7 = vld [vmem:[%s229_s1 + $0x40] sm:$0xff]  ;;  %v32_v8 = vld [vmem:[%s229_s1 + $0x38] sm:$0xff]  ;;  %v31_v9 = vld [vmem:[%s229_s1 + $0x30] sm:$0xff]  ;;  %s147_s27 = smov 8  }
   0x9   :  { %v30_v10 = vld [vmem:[%s229_s1 + $0x28] sm:$0xff]  ;;  %v29_v11 = vld [vmem:[%s229_s1 + $0x20] sm:$0xff]  ;;  %v28_v12 = vld [vmem:[%s229_s1 + $0x18] sm:$0xff] }
   0xa   :  { %45 = vmatpush.msra.mxu0 %v36_v4  ;;  %103 = vmatpush.msra.mxu1 %v36_v4  ;;  %v27_v13 = vld [vmem:[%s229_s1 + $0x10] sm:$0xff]  ;;  %v26_v14 = vld [vmem:[%s229_s1 + $0x8] sm:$0xff]  ;;  %v25_v15 = vld [vmem:[%s229_s1] sm:$0xff]  ;;  %s85_s1 = sshll.u32 %s145_s23, 4  ;;  %s86_s1 = int_to_ptr.vmem [resolvable:$true] %s85_s1 }
   0xb   :  { %v23_v16 = vld [vmem:[%s228_s0] sm:$0xff]  ;;  %v24_v17 = vld [vmem:[%s228_s0 + $0x8] sm:$0xff]  ;;  %s146_s0 = smov 128  }
   0xc   :  { %46 = vmatpush.msra.mxu0 %v35_v5  ;;  %104 = vmatpush.msra.mxu1 %v35_v5  ;;  %v118_v18 = vld [vmem:[%s230_s2] ss:$0 sm:$0xff] }
   0xe   :  { %47 = vmatpush.msra.mxu0 %v34_v6  ;;  %105 = vmatpush.msra.mxu1 %v34_v6 }
  0x10   :  { %48 = vmatpush.msra.mxu0 %v33_v7  ;;  %106 = vmatpush.msra.mxu1 %v33_v7 }
  0x12   :  { %49 = vmatpush.msra.mxu0 %v32_v8  ;;  %107 = vmatpush.msra.mxu1 %v32_v8 }
  0x14   :  { %50 = vmatpush.msra.mxu0 %v31_v9  ;;  %108 = vmatpush.msra.mxu1 %v31_v9 }
  0x16   :  { %51 = vmatpush.msra.mxu0 %v30_v10  ;;  %109 = vmatpush.msra.mxu1 %v30_v10 }
  0x18   :  { %52 = vmatpush.msra.mxu0 %v29_v11  ;;  %110 = vmatpush.msra.mxu1 %v29_v11 }
  0x1a   :  { %53 = vmatpush.msra.mxu0 %v28_v12  ;;  %111 = vmatpush.msra.mxu1 %v28_v12 }
  0x1c   :  { %54 = vmatpush.msra.mxu0 %v27_v13  ;;  %112 = vmatpush.msra.mxu1 %v27_v13 }
  0x1e   :  { %55 = vmatpush.msra.mxu0 %v26_v14  ;;  %113 = vmatpush.msra.mxu1 %v26_v14 }
  0x20   :  { %56 = vmatpush.msra.mxu0 %v25_v15  ;;  %114 = vmatpush.msra.mxu1 %v25_v15 }
  0x21   :  { %57 = vmatmul.f32.vlgmr.msra.gmra.mxu0 %v23_v16  ;;  %60 = vmatmul.f32.vlgmr.msra.gmra.mxu1 %v24_v17 }
  0x9e   :  { %v58_v19 = vpop.f32.mrf.mxu0  ;;  %v61_v20 = vpop.f32.mrf.mxu1 }
  0x9f   :  { %v77_v21 = vadd.f32 %v118_v18, %v58_v19  ;;  %v78_v22 = vadd.f32 %v118_v18, %v61_v20 }
  0xa1   :  { %79 = vst [vmem:[#allocation3] sm:$0xff] %v77_v21 }
  0xa2   :  { %80 = vst [vmem:[#allocation3 + $0x8] sm:$0xff] %v78_v22 }
  0xa3   :  { %93 = dma.vmem_to_hbm [thread:$0]  %s86_s1, 256, %s88_s26, [#allocation4], %s146_s0, %s146_s0, %s147_s27  }
  0xa4   :  { %143 = dma.done.wait [#allocation4], 256  }
  0xa5   :  { %144 = vsyncadd [#allocation4], 4294967040 }
  0xa6   :  { %98 = vsyncpa [#allocation4], 1 }

</bundles_post_ra>
